<compile_context>
chip_gen: v6e
topology: v6e:2x2x1
jax: 0.10.0
libtpu: 0.0.40
codegen_flags: <defaults>
</compile_context>

<pallas_src>
import jax
import jax.numpy as jnp
from jax.experimental import pallas as pl
from jax.experimental.pallas import tpu as pltpu


_R0 = 8  # sublane-aligned row offset of the "real" rows inside the padded scratches


# ---------------------------------------------------------------------------
# Fused Block kernel (single invocation, whole batch, everything in VMEM).
# ---------------------------------------------------------------------------
def _make_block_kernel(N, H, W, Cin, Cout, reps):
    WCin, WCout = W * Cin, W * Cout
    Ho, Wo = H // 2, W // 2
    WoC = Wo * Cout
    R0 = _R0

    def kernel(*refs):
        x_ref = refs[0]                                    # (N, H, W*Cin) lane-packed NHWC
        unit_refs = refs[1:1 + 2 * reps]                   # (banded M (3,wc,WCout), bias) per unit
        wsk_ref, skb_ref, sel_ref = refs[1 + 2 * reps:4 + 2 * reps]
        out_ref = refs[4 + 2 * reps]                       # (N, Ho, Wo*Cout)
        pad_a, pad_b, pool_pad = refs[5 + 2 * reps:8 + 2 * reps]

        # One-time halo init (interiors are fully overwritten each unit).
        pad_a[:, R0 - 1:R0, :] = jnp.zeros((N, 1, WCin), jnp.float32)
        pad_a[:, R0 + H:R0 + H + 1, :] = jnp.zeros((N, 1, WCin), jnp.float32)
        pad_b[:, R0 - 1:R0, :] = jnp.zeros((N, 1, WCout), jnp.float32)
        pad_b[:, R0 + H:R0 + H + 1, :] = jnp.zeros((N, 1, WCout), jnp.float32)
        pool_pad[:, R0 - 1:R0, :] = jnp.full((N, 1, WCout), -jnp.inf, jnp.float32)

        # ---- rep: [ReLU, SepConv, BN] x reps (grow_first=True) ----
        cur = x_ref[...]                                   # (N, H, W*cin)
        for u in range(reps):
            cin = Cin if u == 0 else Cout
            wc = W * cin
            pad = pad_a if u == 0 else pad_b
            m_ref, b_ref = unit_refs[2 * u], unit_refs[2 * u + 1]

            # relu(pad0(x)) == pad0(relu(x)); interior store is sublane-aligned at R0.
            pad[:, R0:R0 + H, :] = jnp.maximum(cur, 0.0)

            # Depthwise 3x3 + pointwise 1x1 + BN scale fused into 3 banded MXU matmuls
            # (one per row tap); column zero-padding lives inside the band structure.
            acc = jnp.zeros((N * H, WCout), jnp.float32)
            for kh in range(3):
                rows = pad[:, R0 - 1 + kh:R0 - 1 + kh + H, :]          # (N, H, wc)
                acc = acc + jnp.dot(rows.reshape(N * H, wc), m_ref[kh],
                                    preferred_element_type=jnp.float32)
            cur = (acc + b_ref[...]).reshape(N, H, WCout)  # folded BN bias (tiled, 1 bcast)

        # ---- MaxPool(3, stride 2, pad 1), entirely in VMEM ----
        pool_pad[:, R0:R0 + H, :] = cur
        r0 = pool_pad[:, pl.ds(R0 - 1, Ho, 2), :]          # rows 2ho-1 (top halo = -inf)
        r1 = pool_pad[:, pl.ds(R0, Ho, 2), :]              # rows 2ho
        r2 = pool_pad[:, pl.ds(R0 + 1, Ho, 2), :]          # rows 2ho+1
        rmax = jnp.maximum(jnp.maximum(r0, r1), r2).reshape(N * Ho, WCout)
        # Column reduction via exact 0/1 selection matmuls (idle MXU, no lane shuffles).
        e = jnp.dot(rmax, sel_ref[0], preferred_element_type=jnp.float32)   # col 2wo
        o = jnp.dot(rmax, sel_ref[1], preferred_element_type=jnp.float32)   # col 2wo+1
        om = jnp.dot(rmax, sel_ref[2], preferred_element_type=jnp.float32)  # col 2wo-1 (wo>=1)
        lane = jax.lax.broadcasted_iota(jnp.int32, (1, WoC), 1)
        om = jnp.where(lane < Cout, -jnp.inf, om)          # column -1 is padding
        pooled = jnp.maximum(jnp.maximum(e, o), om)        # (N*Ho, Wo*Cout)

        # ---- skip: 1x1 conv (stride 2) + folded BN as one block-diag matmul ----
        xs = x_ref[:, pl.ds(0, Ho, 2), :].reshape(N * Ho, WCin)   # even rows of raw x
        sk = jnp.dot(xs, wsk_ref[...], preferred_element_type=jnp.float32) + skb_ref[...]

        out_ref[...] = (pooled + sk).reshape(N, Ho, WoC)   # single lane-dense slab store

    return kernel


def block_forward(packed, x_nchw):
    N, Cin, H, W = x_nchw.shape
    assert H % 2 == 0 and W % 2 == 0
    reps = len(packed["units"])
    Cout = packed["units"][0][0].shape[2] // W
    Ho, Wo = H // 2, W // 2

    # Lane-dense packed input (N, H, W*Cin); pure wrapper-side layout plumbing.
    x = jnp.transpose(x_nchw, (0, 2, 3, 1)).reshape(N, H, W * Cin)

    kernel = _make_block_kernel(N, H, W, Cin, Cout, reps)
    flat = [x]
    for (ms, b) in packed["units"]:
        flat += [ms, b]
    flat += [packed["wskbd"], packed["skb"], packed["sel"]]

    out = pl.pallas_call(
        kernel,
        out_shape=jax.ShapeDtypeStruct((N, Ho, Wo * Cout), jnp.float32),
        scratch_shapes=[
            pltpu.VMEM((N, _R0 + H + 1, W * Cin), jnp.float32),   # zero-halo'ed relu(x)
            pltpu.VMEM((N, _R0 + H + 1, W * Cout), jnp.float32),  # zero-halo'ed relu(y_u)
            pltpu.VMEM((N, _R0 + H, W * Cout), jnp.float32),      # -inf-halo'ed pooling input
        ],
    )(*flat)
    return jnp.transpose(out.reshape(N, Ho, Wo, Cout), (0, 3, 1, 2))  # back to NCHW


# ---------------------------------------------------------------------------
# One-time host-side parameter packing (BN folded, banded / block-diag weights).
# ---------------------------------------------------------------------------
def pack_params(params, H, W):
    units = params["units"]
    Cout = units[0][1].shape[1]
    Wo = W // 2

    packed_units = []
    for (dw, pw, sc, b) in units:
        cin = dw.shape[1]
        pws = pw * sc                                      # fold BN scale into pointwise
        ms = []
        for kh in range(3):
            m = jnp.zeros((W * cin, W * Cout), jnp.float32)
            for kw in range(3):
                shift = jnp.eye(W, k=1 - kw, dtype=jnp.float32)       # band = column tap + pad
                m = m + jnp.kron(shift, dw[3 * kh + kw][:, None] * pws)
            ms.append(m)
        packed_units.append((jnp.stack(ms), jnp.tile(b, (1, W))))

    idx = jnp.arange(Wo)
    p_even = jnp.zeros((W, Wo), jnp.float32).at[2 * idx, idx].set(1.0)
    p_odd = jnp.zeros((W, Wo), jnp.float32).at[2 * idx + 1, idx].set(1.0)
    p_om1 = jnp.zeros((W, Wo), jnp.float32).at[2 * idx[1:] - 1, idx[1:]].set(1.0)
    eye_c = jnp.eye(Cout, dtype=jnp.float32)
    sel = jnp.stack([jnp.kron(p_even, eye_c),              # pooled column selectors
                     jnp.kron(p_odd, eye_c),
                     jnp.kron(p_om1, eye_c)])

    wskbd = jnp.kron(p_even, params["wskip"] * params["skip_scale"])  # stride-2 1x1 conv + BN
    skb = jnp.tile(params["skip_bias"], (1, Wo))
    return {"units": packed_units, "wskbd": wskbd, "skb": skb, "sel": sel}


# ---------------------------------------------------------------------------
# Deterministic parameter init (shapes follow Block.__init__, BN folded to eval mode).
# ---------------------------------------------------------------------------
def init_params(key, cin, cout, reps=2):
    keys = iter(jax.random.split(key, 6 * reps + 6))

    def nk():
        return next(keys)

    def bn_affine(c):
        gamma = 1.0 + 0.1 * jax.random.normal(nk(), (c,), jnp.float32)
        beta = 0.1 * jax.random.normal(nk(), (c,), jnp.float32)
        mean = 0.1 * jax.random.normal(nk(), (c,), jnp.float32)
        var = jax.random.uniform(nk(), (c,), jnp.float32, 0.5, 1.5)
        scale = gamma * jax.lax.rsqrt(var + 1e-5)          # eval-mode BN folded
        bias = beta - mean * scale
        return scale.reshape(1, c), bias.reshape(1, c)

    units = []
    fin = cin
    for _ in range(reps):                                  # grow_first=True -> first unit grows
        dw = 0.2 * jax.random.normal(nk(), (9, fin), jnp.float32)      # depthwise (kh*3+kw, c)
        pw = 0.2 * jax.random.normal(nk(), (fin, cout), jnp.float32)   # pointwise (Cin, Cout)
        sc, b = bn_affine(cout)
        units.append((dw, pw, sc, b))
        fin = cout
    wskip = 0.2 * jax.random.normal(nk(), (cin, cout), jnp.float32)    # skip 1x1 conv
    ssc, sb = bn_affine(cout)
    return {"units": units, "wskip": wskip, "skip_scale": ssc, "skip_bias": sb}


# ---------------------------------------------------------------------------
# Pure-JAX reference (for the correctness check only).
# ---------------------------------------------------------------------------
def reference_forward(params, x_nchw):
    hp = jax.lax.Precision.HIGHEST
    x = jnp.transpose(x_nchw, (0, 2, 3, 1))
    y = x
    for (dw, pw, sc, b) in params["units"]:
        cin = y.shape[-1]
        yr = jax.nn.relu(y)
        dk = dw.reshape(3, 3, 1, cin)
        y = jax.lax.conv_general_dilated(
            yr, dk, window_strides=(1, 1), padding=((1, 1), (1, 1)),
            dimension_numbers=("NHWC", "HWIO", "NHWC"),
            feature_group_count=cin, precision=hp)
        y = jnp.einsum("nhwc,co->nhwo", y, pw, precision=hp)
        y = y * sc + b
    y = jax.lax.reduce_window(y, -jnp.inf, jax.lax.max,
                              (1, 3, 3, 1), (1, 2, 2, 1),
                              ((0, 0), (1, 1), (1, 1), (0, 0)))
    skip = jnp.einsum("nhwc,co->nhwo", x[:, ::2, ::2, :], params["wskip"], precision=hp)
    skip = skip * params["skip_scale"] + params["skip_bias"]
    return jnp.transpose(y + skip, (0, 3, 1, 2))


if __name__ == "__main__":
    N, H, W = 2, 16, 16
    IN_FILTERS, OUT_FILTERS, REPS, STRIDES = 4, 8, 2, 2

    key = jax.random.PRNGKey(0)
    kx, kp = jax.random.split(key)
    x = jax.random.normal(kx, (N, IN_FILTERS, H, W), jnp.float32)      # NCHW like the module
    params = init_params(kp, IN_FILTERS, OUT_FILTERS, REPS)
    packed = pack_params(params, H, W)                                 # one-time host-side prep

    fwd = jax.jit(lambda inp: block_forward(packed, inp))
    out = jax.block_until_ready(fwd(x))
    assert out.shape == (N, OUT_FILTERS, H // STRIDES, W // STRIDES), out.shape

    ref = reference_forward(params, x)
    max_err = float(jnp.max(jnp.abs(out - ref)))
    if max_err > 1e-3:
        raise AssertionError(f"Pallas output mismatch vs reference, max_abs_err={max_err}")
    print("KERNEL_OK")
</pallas_src>

<mosaic_0001>
module attributes {stable_mosaic.version = 11 : i64} {
  func.func @kernel(%arg0: memref<2x16x64xf32, #tpu.memory_space<vmem>>, %arg1: memref<3x64x128xf32, #tpu.memory_space<vmem>>, %arg2: memref<1x128xf32, #tpu.memory_space<vmem>>, %arg3: memref<3x128x128xf32, #tpu.memory_space<vmem>>, %arg4: memref<1x128xf32, #tpu.memory_space<vmem>>, %arg5: memref<64x64xf32, #tpu.memory_space<vmem>>, %arg6: memref<1x64xf32, #tpu.memory_space<vmem>>, %arg7: memref<3x128x64xf32, #tpu.memory_space<vmem>>, %arg8: memref<2x8x64xf32, #tpu.memory_space<vmem>>, %arg9: memref<2x25x64xf32, #tpu.memory_space<vmem>>, %arg10: memref<2x25x128xf32, #tpu.memory_space<vmem>>, %arg11: memref<2x24x128xf32, #tpu.memory_space<vmem>>) attributes {dimension_semantics = [], scalar_prefetch = 0 : i64, scratch_operands = 3 : i64, tpu.core_type = #tpu.core_type<tc>} {
    %cst = arith.constant 0.000000e+00 : f32
    %0 = vector.broadcast %cst : f32 to vector<2x1x64xf32>
    %c0 = arith.constant 0 : index
    %c7 = arith.constant 7 : index
    %c0_0 = arith.constant 0 : index
    %1 = vector.load %arg9[%c0, %c7, %c0_0] : memref<2x25x64xf32, #tpu.memory_space<vmem>>, vector<2x1x64xf32>
    tpu.vector_store %arg9[%c0, %c7, %c0_0], %0 {strides = array<i32>} : memref<2x25x64xf32, #tpu.memory_space<vmem>>, vector<2x1x64xf32>,
    %cst_1 = arith.constant 0.000000e+00 : f32
    %2 = vector.broadcast %cst_1 : f32 to vector<2x1x64xf32>
    %c0_2 = arith.constant 0 : index
    %c24 = arith.constant 24 : index
    %c0_3 = arith.constant 0 : index
    %3 = vector.load %arg9[%c0_2, %c24, %c0_3] : memref<2x25x64xf32, #tpu.memory_space<vmem>>, vector<2x1x64xf32>
    tpu.vector_store %arg9[%c0_2, %c24, %c0_3], %2 {strides = array<i32>} : memref<2x25x64xf32, #tpu.memory_space<vmem>>, vector<2x1x64xf32>,
    %cst_4 = arith.constant 0.000000e+00 : f32
    %4 = vector.broadcast %cst_4 : f32 to vector<2x1x128xf32>
    %c0_5 = arith.constant 0 : index
    %c7_6 = arith.constant 7 : index
    %c0_7 = arith.constant 0 : index
    %5 = vector.load %arg10[%c0_5, %c7_6, %c0_7] : memref<2x25x128xf32, #tpu.memory_space<vmem>>, vector<2x1x128xf32>
    tpu.vector_store %arg10[%c0_5, %c7_6, %c0_7], %4 {strides = array<i32>} : memref<2x25x128xf32, #tpu.memory_space<vmem>>, vector<2x1x128xf32>,
    %cst_8 = arith.constant 0.000000e+00 : f32
    %6 = vector.broadcast %cst_8 : f32 to vector<2x1x128xf32>
    %c0_9 = arith.constant 0 : index
    %c24_10 = arith.constant 24 : index
    %c0_11 = arith.constant 0 : index
    %7 = vector.load %arg10[%c0_9, %c24_10, %c0_11] : memref<2x25x128xf32, #tpu.memory_space<vmem>>, vector<2x1x128xf32>
    tpu.vector_store %arg10[%c0_9, %c24_10, %c0_11], %6 {strides = array<i32>} : memref<2x25x128xf32, #tpu.memory_space<vmem>>, vector<2x1x128xf32>,
    %cst_12 = arith.constant 0xFF800000 : f32
    %8 = vector.broadcast %cst_12 : f32 to vector<2x1x128xf32>
    %c0_13 = arith.constant 0 : index
    %c7_14 = arith.constant 7 : index
    %c0_15 = arith.constant 0 : index
    %9 = vector.load %arg11[%c0_13, %c7_14, %c0_15] : memref<2x24x128xf32, #tpu.memory_space<vmem>>, vector<2x1x128xf32>
    tpu.vector_store %arg11[%c0_13, %c7_14, %c0_15], %8 {strides = array<i32>} : memref<2x24x128xf32, #tpu.memory_space<vmem>>, vector<2x1x128xf32>,
    %c0_16 = arith.constant 0 : index
    %c0_17 = arith.constant 0 : index
    %c0_18 = arith.constant 0 : index
    %10 = vector.load %arg0[%c0_16, %c0_17, %c0_18] : memref<2x16x64xf32, #tpu.memory_space<vmem>>, vector<2x16x64xf32>
    %cst_19 = arith.constant 0.000000e+00 : f32
    %11 = vector.broadcast %cst_19 : f32 to vector<2x16x64xf32>
    %12 = arith.maximumf %10, %11 : vector<2x16x64xf32>
    %c0_20 = arith.constant 0 : index
    %c8 = arith.constant 8 : index
    %c0_21 = arith.constant 0 : index
    %13 = vector.load %arg9[%c0_20, %c8, %c0_21] : memref<2x25x64xf32, #tpu.memory_space<vmem>>, vector<2x16x64xf32>
    tpu.vector_store %arg9[%c0_20, %c8, %c0_21], %12 {strides = array<i32>} : memref<2x25x64xf32, #tpu.memory_space<vmem>>, vector<2x16x64xf32>,
    %cst_22 = arith.constant 0.000000e+00 : f32
    %14 = vector.broadcast %cst_22 : f32 to vector<32x128xf32>
    %c0_23 = arith.constant 0 : index
    %c7_24 = arith.constant 7 : index
    %c0_25 = arith.constant 0 : index
    %15 = vector.load %arg9[%c0_23, %c7_24, %c0_25] : memref<2x25x64xf32, #tpu.memory_space<vmem>>, vector<2x16x64xf32>
    %16 = vector.shape_cast %15 : vector<2x16x64xf32> to vector<32x64xf32>
    %c0_26 = arith.constant 0 : index
    %c0_27 = arith.constant 0 : index
    %c0_28 = arith.constant 0 : index
    %17 = vector.load %arg1[%c0_26, %c0_27, %c0_28] : memref<3x64x128xf32, #tpu.memory_space<vmem>>, vector<1x64x128xf32>
    %18 = vector.shape_cast %17 : vector<1x64x128xf32> to vector<64x128xf32>
    %cst_29 = arith.constant dense<0.000000e+00> : vector<32x128xf32>
    %19 = tpu.matmul %16, %18, %cst_29 {dimension_numbers = #tpu.dot_dimension_numbers<[1], [0], [0], [1], [0, 0, 1, 1], [], []>} : vector<32x64xf32>, vector<64x128xf32>, vector<32x128xf32> -> vector<32x128xf32>
    %20 = arith.addf %14, %19 : vector<32x128xf32>
    %c0_30 = arith.constant 0 : index
    %c8_31 = arith.constant 8 : index
    %c0_32 = arith.constant 0 : index
    %21 = vector.load %arg9[%c0_30, %c8_31, %c0_32] : memref<2x25x64xf32, #tpu.memory_space<vmem>>, vector<2x16x64xf32>
    %22 = vector.shape_cast %21 : vector<2x16x64xf32> to vector<32x64xf32>
    %c1 = arith.constant 1 : index
    %c0_33 = arith.constant 0 : index
    %c0_34 = arith.constant 0 : index
    %23 = vector.load %arg1[%c1, %c0_33, %c0_34] : memref<3x64x128xf32, #tpu.memory_space<vmem>>, vector<1x64x128xf32>
    %24 = vector.shape_cast %23 : vector<1x64x128xf32> to vector<64x128xf32>
    %cst_35 = arith.constant dense<0.000000e+00> : vector<32x128xf32>
    %25 = tpu.matmul %22, %24, %cst_35 {dimension_numbers = #tpu.dot_dimension_numbers<[1], [0], [0], [1], [0, 0, 1, 1], [], []>} : vector<32x64xf32>, vector<64x128xf32>, vector<32x128xf32> -> vector<32x128xf32>
    %26 = arith.addf %20, %25 : vector<32x128xf32>
    %c0_36 = arith.constant 0 : index
    %c9 = arith.constant 9 : index
    %c0_37 = arith.constant 0 : index
    %27 = vector.load %arg9[%c0_36, %c9, %c0_37] : memref<2x25x64xf32, #tpu.memory_space<vmem>>, vector<2x16x64xf32>
    %28 = vector.shape_cast %27 : vector<2x16x64xf32> to vector<32x64xf32>
    %c2 = arith.constant 2 : index
    %c0_38 = arith.constant 0 : index
    %c0_39 = arith.constant 0 : index
    %29 = vector.load %arg1[%c2, %c0_38, %c0_39] : memref<3x64x128xf32, #tpu.memory_space<vmem>>, vector<1x64x128xf32>
    %30 = vector.shape_cast %29 : vector<1x64x128xf32> to vector<64x128xf32>
    %cst_40 = arith.constant dense<0.000000e+00> : vector<32x128xf32>
    %31 = tpu.matmul %28, %30, %cst_40 {dimension_numbers = #tpu.dot_dimension_numbers<[1], [0], [0], [1], [0, 0, 1, 1], [], []>} : vector<32x64xf32>, vector<64x128xf32>, vector<32x128xf32> -> vector<32x128xf32>
    %32 = arith.addf %26, %31 : vector<32x128xf32>
    %c0_41 = arith.constant 0 : index
    %c0_42 = arith.constant 0 : index
    %33 = vector.load %arg2[%c0_41, %c0_42] : memref<1x128xf32, #tpu.memory_space<vmem>>, vector<1x128xf32>
    %34 = vector.broadcast %33 : vector<1x128xf32> to vector<32x128xf32>
    %35 = arith.addf %32, %34 : vector<32x128xf32>
    %36 = vector.shape_cast %35 : vector<32x128xf32> to vector<2x16x128xf32>
    %cst_43 = arith.constant 0.000000e+00 : f32
    %37 = vector.broadcast %cst_43 : f32 to vector<2x16x128xf32>
    %38 = arith.maximumf %36, %37 : vector<2x16x128xf32>
    %c0_44 = arith.constant 0 : index
    %c8_45 = arith.constant 8 : index
    %c0_46 = arith.constant 0 : index
    %39 = vector.load %arg10[%c0_44, %c8_45, %c0_46] : memref<2x25x128xf32, #tpu.memory_space<vmem>>, vector<2x16x128xf32>
    tpu.vector_store %arg10[%c0_44, %c8_45, %c0_46], %38 {strides = array<i32>} : memref<2x25x128xf32, #tpu.memory_space<vmem>>, vector<2x16x128xf32>,
    %cst_47 = arith.constant 0.000000e+00 : f32
    %40 = vector.broadcast %cst_47 : f32 to vector<32x128xf32>
    %c0_48 = arith.constant 0 : index
    %c7_49 = arith.constant 7 : index
    %c0_50 = arith.constant 0 : index
    %41 = vector.load %arg10[%c0_48, %c7_49, %c0_50] : memref<2x25x128xf32, #tpu.memory_space<vmem>>, vector<2x16x128xf32>
    %42 = vector.shape_cast %41 : vector<2x16x128xf32> to vector<32x128xf32>
    %c0_51 = arith.constant 0 : index
    %c0_52 = arith.constant 0 : index
    %c0_53 = arith.constant 0 : index
    %43 = vector.load %arg3[%c0_51, %c0_52, %c0_53] : memref<3x128x128xf32, #tpu.memory_space<vmem>>, vector<1x128x128xf32>
    %44 = vector.shape_cast %43 : vector<1x128x128xf32> to vector<128x128xf32>
    %cst_54 = arith.constant dense<0.000000e+00> : vector<32x128xf32>
    %45 = tpu.matmul %42, %44, %cst_54 {dimension_numbers = #tpu.dot_dimension_numbers<[1], [0], [0], [1], [0, 0, 1, 1], [], []>} : vector<32x128xf32>, vector<128x128xf32>, vector<32x128xf32> -> vector<32x128xf32>
    %46 = arith.addf %40, %45 : vector<32x128xf32>
    %c0_55 = arith.constant 0 : index
    %c8_56 = arith.constant 8 : index
    %c0_57 = arith.constant 0 : index
    %47 = vector.load %arg10[%c0_55, %c8_56, %c0_57] : memref<2x25x128xf32, #tpu.memory_space<vmem>>, vector<2x16x128xf32>
    %48 = vector.shape_cast %47 : vector<2x16x128xf32> to vector<32x128xf32>
    %c1_58 = arith.constant 1 : index
    %c0_59 = arith.constant 0 : index
    %c0_60 = arith.constant 0 : index
    %49 = vector.load %arg3[%c1_58, %c0_59, %c0_60] : memref<3x128x128xf32, #tpu.memory_space<vmem>>, vector<1x128x128xf32>
    %50 = vector.shape_cast %49 : vector<1x128x128xf32> to vector<128x128xf32>
    %cst_61 = arith.constant dense<0.000000e+00> : vector<32x128xf32>
    %51 = tpu.matmul %48, %50, %cst_61 {dimension_numbers = #tpu.dot_dimension_numbers<[1], [0], [0], [1], [0, 0, 1, 1], [], []>} : vector<32x128xf32>, vector<128x128xf32>, vector<32x128xf32> -> vector<32x128xf32>
    %52 = arith.addf %46, %51 : vector<32x128xf32>
    %c0_62 = arith.constant 0 : index
    %c9_63 = arith.constant 9 : index
    %c0_64 = arith.constant 0 : index
    %53 = vector.load %arg10[%c0_62, %c9_63, %c0_64] : memref<2x25x128xf32, #tpu.memory_space<vmem>>, vector<2x16x128xf32>
    %54 = vector.shape_cast %53 : vector<2x16x128xf32> to vector<32x128xf32>
    %c2_65 = arith.constant 2 : index
    %c0_66 = arith.constant 0 : index
    %c0_67 = arith.constant 0 : index
    %55 = vector.load %arg3[%c2_65, %c0_66, %c0_67] : memref<3x128x128xf32, #tpu.memory_space<vmem>>, vector<1x128x128xf32>
    %56 = vector.shape_cast %55 : vector<1x128x128xf32> to vector<128x128xf32>
    %cst_68 = arith.constant dense<0.000000e+00> : vector<32x128xf32>
    %57 = tpu.matmul %54, %56, %cst_68 {dimension_numbers = #tpu.dot_dimension_numbers<[1], [0], [0], [1], [0, 0, 1, 1], [], []>} : vector<32x128xf32>, vector<128x128xf32>, vector<32x128xf32> -> vector<32x128xf32>
    %58 = arith.addf %52, %57 : vector<32x128xf32>
    %c0_69 = arith.constant 0 : index
    %c0_70 = arith.constant 0 : index
    %59 = vector.load %arg4[%c0_69, %c0_70] : memref<1x128xf32, #tpu.memory_space<vmem>>, vector<1x128xf32>
    %60 = vector.broadcast %59 : vector<1x128xf32> to vector<32x128xf32>
    %61 = arith.addf %58, %60 : vector<32x128xf32>
    %62 = vector.shape_cast %61 : vector<32x128xf32> to vector<2x16x128xf32>
    %c0_71 = arith.constant 0 : index
    %c8_72 = arith.constant 8 : index
    %c0_73 = arith.constant 0 : index
    %63 = vector.load %arg11[%c0_71, %c8_72, %c0_73] : memref<2x24x128xf32, #tpu.memory_space<vmem>>, vector<2x16x128xf32>
    tpu.vector_store %arg11[%c0_71, %c8_72, %c0_73], %62 {strides = array<i32>} : memref<2x24x128xf32, #tpu.memory_space<vmem>>, vector<2x16x128xf32>,
    %c0_74 = arith.constant 0 : index
    %c7_75 = arith.constant 7 : index
    %c0_76 = arith.constant 0 : index
    %64 = tpu.strided_load %arg11[%c0_74, %c7_75, %c0_76] {strides = array<i32: 1, 2, 1>} : memref<2x24x128xf32, #tpu.memory_space<vmem>>, vector<2x8x128xf32>
    %c0_77 = arith.constant 0 : index
    %c8_78 = arith.constant 8 : index
    %c0_79 = arith.constant 0 : index
    %65 = tpu.strided_load %arg11[%c0_77, %c8_78, %c0_79] {strides = array<i32: 1, 2, 1>} : memref<2x24x128xf32, #tpu.memory_space<vmem>>, vector<2x8x128xf32>
    %c0_80 = arith.constant 0 : index
    %c9_81 = arith.constant 9 : index
    %c0_82 = arith.constant 0 : index
    %66 = tpu.strided_load %arg11[%c0_80, %c9_81, %c0_82] {strides = array<i32: 1, 2, 1>} : memref<2x24x128xf32, #tpu.memory_space<vmem>>, vector<2x8x128xf32>
    %67 = arith.maximumf %64, %65 : vector<2x8x128xf32>
    %68 = arith.maximumf %67, %66 : vector<2x8x128xf32>
    %69 = vector.shape_cast %68 : vector<2x8x128xf32> to vector<16x128xf32>
    %c0_83 = arith.constant 0 : index
    %c0_84 = arith.constant 0 : index
    %c0_85 = arith.constant 0 : index
    %70 = vector.load %arg7[%c0_83, %c0_84, %c0_85] : memref<3x128x64xf32, #tpu.memory_space<vmem>>, vector<1x128x64xf32>
    %71 = vector.shape_cast %70 : vector<1x128x64xf32> to vector<128x64xf32>
    %cst_86 = arith.constant dense<0.000000e+00> : vector<16x64xf32>
    %72 = tpu.matmul %69, %71, %cst_86 {dimension_numbers = #tpu.dot_dimension_numbers<[1], [0], [0], [1], [0, 0, 1, 1], [], []>} : vector<16x128xf32>, vector<128x64xf32>, vector<16x64xf32> -> vector<16x64xf32>
    %c1_87 = arith.constant 1 : index
    %c0_88 = arith.constant 0 : index
    %c0_89 = arith.constant 0 : index
    %73 = vector.load %arg7[%c1_87, %c0_88, %c0_89] : memref<3x128x64xf32, #tpu.memory_space<vmem>>, vector<1x128x64xf32>
    %74 = vector.shape_cast %73 : vector<1x128x64xf32> to vector<128x64xf32>
    %cst_90 = arith.constant dense<0.000000e+00> : vector<16x64xf32>
    %75 = tpu.matmul %69, %74, %cst_90 {dimension_numbers = #tpu.dot_dimension_numbers<[1], [0], [0], [1], [0, 0, 1, 1], [], []>} : vector<16x128xf32>, vector<128x64xf32>, vector<16x64xf32> -> vector<16x64xf32>
    %c2_91 = arith.constant 2 : index
    %c0_92 = arith.constant 0 : index
    %c0_93 = arith.constant 0 : index
    %76 = vector.load %arg7[%c2_91, %c0_92, %c0_93] : memref<3x128x64xf32, #tpu.memory_space<vmem>>, vector<1x128x64xf32>
    %77 = vector.shape_cast %76 : vector<1x128x64xf32> to vector<128x64xf32>
    %cst_94 = arith.constant dense<0.000000e+00> : vector<16x64xf32>
    %78 = tpu.matmul %69, %77, %cst_94 {dimension_numbers = #tpu.dot_dimension_numbers<[1], [0], [0], [1], [0, 0, 1, 1], [], []>} : vector<16x128xf32>, vector<128x64xf32>, vector<16x64xf32> -> vector<16x64xf32>
    %79 = tpu.iota {dimensions = array<i32: 1>} : vector<1x64xi32>
    %c8_i32 = arith.constant 8 : i32
    %80 = vector.broadcast %c8_i32 : i32 to vector<1x64xi32>
    %81 = arith.cmpi slt, %79, %80 : vector<1x64xi32>
    %cst_95 = arith.constant 0xFF800000 : f32
    %82 = vector.shape_cast %81 : vector<1x64xi1> to vector<1x64xi1>
    %83 = vector.broadcast %82 : vector<1x64xi1> to vector<16x64xi1>
    %84 = vector.broadcast %cst_95 : f32 to vector<16x64xf32>
    %85 = arith.select %83, %84, %78 : vector<16x64xi1>, vector<16x64xf32>
    %86 = arith.maximumf %72, %75 : vector<16x64xf32>
    %87 = arith.maximumf %86, %85 : vector<16x64xf32>
    %c0_96 = arith.constant 0 : index
    %c0_97 = arith.constant 0 : index
    %c0_98 = arith.constant 0 : index
    %88 = tpu.strided_load %arg0[%c0_96, %c0_97, %c0_98] {strides = array<i32: 1, 2, 1>} : memref<2x16x64xf32, #tpu.memory_space<vmem>>, vector<2x8x64xf32>
    %89 = vector.shape_cast %88 : vector<2x8x64xf32> to vector<16x64xf32>
    %c0_99 = arith.constant 0 : index
    %c0_100 = arith.constant 0 : index
    %90 = vector.load %arg5[%c0_99, %c0_100] : memref<64x64xf32, #tpu.memory_space<vmem>>, vector<64x64xf32>
    %cst_101 = arith.constant dense<0.000000e+00> : vector<16x64xf32>
    %91 = tpu.matmul %89, %90, %cst_101 {dimension_numbers = #tpu.dot_dimension_numbers<[1], [0], [0], [1], [0, 0, 1, 1], [], []>} : vector<16x64xf32>, vector<64x64xf32>, vector<16x64xf32> -> vector<16x64xf32>
    %c0_102 = arith.constant 0 : index
    %c0_103 = arith.constant 0 : index
    %92 = vector.load %arg6[%c0_102, %c0_103] : memref<1x64xf32, #tpu.memory_space<vmem>>, vector<1x64xf32>
    %93 = vector.broadcast %92 : vector<1x64xf32> to vector<16x64xf32>
    %94 = arith.addf %91, %93 : vector<16x64xf32>
    %95 = arith.addf %87, %94 : vector<16x64xf32>
    %96 = vector.shape_cast %95 : vector<16x64xf32> to vector<2x8x64xf32>
    %c0_104 = arith.constant 0 : index
    %c0_105 = arith.constant 0 : index
    %c0_106 = arith.constant 0 : index
    %97 = vector.load %arg8[%c0_104, %c0_105, %c0_106] : memref<2x8x64xf32, #tpu.memory_space<vmem>>, vector<2x8x64xf32>
    tpu.vector_store %arg8[%c0_104, %c0_105, %c0_106], %96 {strides = array<i32>} : memref<2x8x64xf32, #tpu.memory_space<vmem>>, vector<2x8x64xf32>,
    return
  }
}

</mosaic_0001>

<bundles_post_ra>
// kernel: _lambda_.1
= control target key start
LH: loop header
LB: loop body
LE: loop exit
PB: predicated region body
PF: predicated region fallthrough
CT: control target
= control target key end

     0   :  { %13 = vsyncpa [#allocation6], 0  ;;  %s2041_s0 = inlined_call_operand.vmem [shape: f32[2,16,64], index: 0, kind: input, shape index: {}]   ;;  %s2042_s1 = inlined_call_operand.hbm [shape: f32[3,64,128], index: 1, kind: input, shape index: {}]   ;;  %s2043_s2 = inlined_call_operand.vmem [shape: f32[1,128], index: 2, kind: input, shape index: {}]   ;;  %s2044_s3 = inlined_call_operand.hbm [shape: f32[3,128,128], index: 3, kind: input, shape index: {}]   ;;  %s2045_s4 = inlined_call_operand.vmem [shape: f32[1,128], index: 4, kind: input, shape index: {}]   ;;  %s2046_s5 = inlined_call_operand.hbm [shape: f32[64,64], index: 5, kind: input, shape index: {}]   ;;  %s2047_s6 = inlined_call_operand.vmem [shape: f32[1,64], index: 6, kind: input, shape index: {}]   ;;  %s2048_s7 = inlined_call_operand.vmem [shape: f32[3,128,64], index: 7, kind: input, shape index: {}]   ;;  %s2049_s8 = inlined_call_operand.vmem [shape: f32[2,8,64], index: 8, kind: output, shape index: {}]  }
   0x1   :  { %14 = vsyncpa [#allocation8], 0  ;;  %s1778_s27 = smov [#allocation7]   ;;  %s1779_s29 = smov [#allocation5]  }
   0x2   :  { %s36_s28 = sshll.u32 %s1778_s27, 4  ;;  %s22_s30 = sshll.u32 %s1779_s29, 4  ;;  %s37_s28 = int_to_ptr.vmem [resolvable:$true] %s36_s28  ;;  %s23_s30 = int_to_ptr.vmem [resolvable:$true] %s22_s30 }
   0x3   :  { %s1722_s9 = scalar_lea.vmem %s37_s28, 6144  ;;  %p1727_p1 = scmp.lt.s32.totalorder %s37_s28, %s37_s28 }
   0x4   :  { %p1723_p0 = scmp.ne.s32.totalorder %s37_s28, %s1722_s9  ;;  %p1728_p2 = scmp.lt.s32.totalorder %s1722_s9, %s1722_s9 }
   0x6   :  { %p1729_p3 = por %p1728_p2, %p1727_p1 }
   0x8   :  { %p1730_p4 = pnand %p1729_p3, %p1723_p0 }
   0xa   :  { %1733 = shalt.err (!%p1730_p4)
}
   0xb   :  { %s1780_s10 = smov 128   ;;  %s1781_s11 = smov 8  }
   0xc   :  { %42 = dma.hbm_to_vmem [thread:$0]  %s2044_s3, 6144, %s37_s28, [#allocation8], %s1780_s10, %s1780_s10, %s1781_s11  }
   0xd   :  { %s1742_s14 = scalar_lea.vmem %s23_s30, 3072  ;;  %p1747_p6 = scmp.lt.s32.totalorder %s23_s30, %s23_s30 }
   0xe   :  { %p1743_p5 = scmp.ne.s32.totalorder %s23_s30, %s1742_s14  ;;  %p1748_p7 = scmp.lt.s32.totalorder %s1742_s14, %s1742_s14 }
  0x10   :  { %p1749_p8 = por %p1748_p7, %p1747_p6 }
  0x12   :  { %p1750_p9 = pnand %p1749_p8, %p1743_p5 }
  0x14   :  { %1753 = shalt.err (!%p1750_p9)
}
  0x15   :  { %28 = dma.hbm_to_vmem [thread:$0]  %s2042_s1, 3072, %s23_s30, [#allocation6], %s1780_s10, %s1780_s10, %s1781_s11  }
  0x16   :  { %s1782_s17 = smov [#allocation9]  }
  0x17   :  { %s50_s18 = sshll.u32 %s1782_s17, 4  ;;  %s51_s18 = int_to_ptr.vmem [resolvable:$true] %s50_s18 }
  0x18   :  { %s1762_s19 = scalar_lea.vmem %s51_s18, 1024  ;;  %p1767_p11 = scmp.lt.s32.totalorder %s51_s18, %s51_s18 }
  0x19   :  { %p1763_p10 = scmp.ne.s32.totalorder %s51_s18, %s1762_s19  ;;  %p1768_p12 = scmp.lt.s32.totalorder %s1762_s19, %s1762_s19 }
  0x1b   :  { %p1769_p13 = por %p1768_p12, %p1767_p11 }
  0x1d   :  { %p1770_p0 = pnand %p1769_p13, %p1763_p10 }
  0x1f   :  { %1773 = shalt.err (!%p1770_p0)
}
  0x20   :  { %56 = dma.hbm_to_vmem [thread:$0]  %s2046_s5, 1024, %s51_s18, [#allocation8], %s1780_s10, %s1780_s10, %s1781_s11  }
  0x21   :  { %1774 = dma.done.wait [#allocation6], 3072  }
  0x22   :  { %1775 = vsyncadd [#allocation6], 4294964224 }
  0x23   :  { %1776 = dma.done.wait [#allocation8], 7168  }
  0x24   :  { %1777 = vsyncadd [#allocation8], 4294960128  ;;  %vm70_vm0 = vcmask 516096   ;;  %v1783_v0 = vmov 0.0   ;;  %v118_v1 = vld [vmem:[#allocation5 + $0x78] sm:$0xff]  ;;  %v117_v3 = vld [vmem:[#allocation5 + $0x70] sm:$0xff] }
  0x25   :  { %71 = vst.msk [vmem:[#allocation2 + $0x7] sm:$0x1] %vm70_vm0, %v1783_v0  ;;  %72 = vst.msk [vmem:[#allocation2 + $0x27] sm:$0x1] %vm70_vm0, %v1783_v0  ;;  %v105_v2 = vld [vmem:[#allocation5 + $0x38] sm:$0xff]  ;;  %1403 = vmatprep.subr.mxu0 %v118_v1  ;;  %v104_v4 = vld [vmem:[#allocation5 + $0x30] sm:$0xff] }
  0x26   :  { %73 = vst.msk [vmem:[#allocation2 + $0x18] sm:$0x1] %vm70_vm0, %v1783_v0  ;;  %74 = vst.msk [vmem:[#allocation2 + $0x38] sm:$0x1] %vm70_vm0, %v1783_v0  ;;  %1425 = vmatprep.subr.mxu1 %v105_v2  ;;  %1404 = vmatpush3.msra.mxu0 %v118_v1  ;;  %v116_v5 = vld [vmem:[#allocation5 + $0x68] sm:$0xff]  ;;  %v115_v7 = vld [vmem:[#allocation5 + $0x60] sm:$0xff] }
  0x27   :  { %75 = vst [vmem:[#allocation3 + $0x7] sm:$0x1] %v1783_v0  ;;  %76 = vst [vmem:[#allocation3 + $0x27] sm:$0x1] %v1783_v0  ;;  %1426 = vmatpush3.msra.mxu1 %v105_v2  ;;  %v103_v6 = vld [vmem:[#allocation5 + $0x28] sm:$0xff]  ;;  %1405 = vmatprep.subr.mxu0 %v117_v3  ;;  %v102_v8 = vld [vmem:[#allocation5 + $0x20] sm:$0xff] }
  0x28   :  { %77 = vst [vmem:[#allocation3 + $0x18] sm:$0x1] %v1783_v0  ;;  %78 = vst [vmem:[#allocation3 + $0x38] sm:$0x1] %v1783_v0  ;;  %1427 = vmatprep.subr.mxu1 %v104_v4  ;;  %1406 = vmatpush3.msra.mxu0 %v117_v3  ;;  %v81_v9 = vld [vmem:[%s2041_s0] sm:$0xff]  ;;  %vm89_vm1 = vcmask 523264  }
  0x29   :  { %1428 = vmatpush3.msra.mxu1 %v104_v4  ;;  %1407 = vmatprep.subr.mxu0 %v116_v5  ;;  %v82_v10 = vld [vmem:[%s2041_s0 + $0x8] sm:$0xff]  ;;  %v85_v13 = vmax.f32 %v81_v9, 0.0  ;;  %v83_v15 = vld [vmem:[%s2041_s0 + $0x10] sm:$0xff]  ;;  %v113_v16 = vld [vmem:[#allocation5 + $0x50] sm:$0xff] }
  0x2a   :  { %1429 = vmatprep.subr.mxu1 %v103_v6  ;;  %1408 = vmatpush3.msra.mxu0 %v116_v5  ;;  %v114_v11 = vld [vmem:[#allocation5 + $0x58] sm:$0xff]  ;;  %v86_v14 = vmax.f32 %v82_v10, 0.0  ;;  %v100_v17 = vld [vmem:[#allocation5 + $0x10] sm:$0xff]  ;;  %v87_v18 = vmax.f32 %v83_v15, 0.0  ;;  %v84_v19 = vld [vmem:[%s2041_s0 + $0x18] sm:$0xff] }
  0x2b   :  { %1430 = vmatpush3.msra.mxu1 %v103_v6  ;;  %v101_v12 = vld [vmem:[#allocation5 + $0x18] sm:$0xff]  ;;  %1409 = vmatprep.subr.mxu0 %v115_v7  ;;  %90 = vst.msk [vmem:[#allocation2 + $0x8] sm:$0xff] %vm89_vm1, %v85_v13  ;;  %v88_v20 = vmax.f32 %v84_v19, 0.0  ;;  %v112_v21 = vld [vmem:[#allocation5 + $0x48] sm:$0xff]  ;;  %v111_v23 = vld [vmem:[#allocation5 + $0x40] sm:$0xff] }
  0x2c   :  { %1431 = vmatprep.subr.mxu1 %v102_v8  ;;  %1410 = vmatpush3.msra.mxu0 %v115_v7  ;;  %91 = vst.msk [vmem:[#allocation2 + $0x10] sm:$0xff] %vm89_vm1, %v86_v14  ;;  %v99_v22 = vld [vmem:[#allocation5 + $0x8] sm:$0xff]  ;;  %92 = vst.msk [vmem:[#allocation2 + $0x28] sm:$0xff] %vm89_vm1, %v87_v18  ;;  %v98_v24 = vld [vmem:[#allocation5] sm:$0xff] }
  0x2d   :  { %1432 = vmatpush3.msra.mxu1 %v102_v8  ;;  %1411 = vmatprep.subr.mxu0 %v114_v11  ;;  %93 = vst.msk [vmem:[#allocation2 + $0x30] sm:$0xff] %vm89_vm1, %v88_v20  ;;  %v325_v29 = vld [vmem:[#allocation5 + $0xb8] sm:$0xff]  ;;  %v324_v32 = vld [vmem:[#allocation5 + $0xb0] sm:$0xff]  ;;  %v323_v34 = vld [vmem:[#allocation5 + $0xa8] sm:$0xff] }
  0x2e   :  { %1433 = vmatprep.subr.mxu1 %v101_v12  ;;  %1412 = vmatpush3.msra.mxu0 %v114_v11  ;;  %v322_v37 = vld [vmem:[#allocation5 + $0xa0] sm:$0xff]  ;;  %v321_v38 = vld [vmem:[#allocation5 + $0x98] sm:$0xff]  ;;  %v320_v39 = vld [vmem:[#allocation5 + $0x90] sm:$0xff] }
  0x2f   :  { %1434 = vmatpush3.msra.mxu1 %v101_v12  ;;  %1413 = vmatprep.subr.mxu0 %v113_v16  ;;  %v319_v40 = vld [vmem:[#allocation5 + $0x88] sm:$0xff]  ;;  %v318_v41 = vld [vmem:[#allocation5 + $0x80] sm:$0xff]  ;;  %v486_v45 = vld [vmem:[#allocation7 + $0xf8] sm:$0xff] }
  0x30   :  { %1435 = vmatprep.subr.mxu1 %v100_v17  ;;  %1414 = vmatpush3.msra.mxu0 %v113_v16  ;;  %v485_v46 = vld [vmem:[#allocation7 + $0xf0] sm:$0xff]  ;;  %v484_v47 = vld [vmem:[#allocation7 + $0xe8] sm:$0xff]  ;;  %v483_v48 = vld [vmem:[#allocation7 + $0xe0] sm:$0xff] }
  0x31   :  { %1436 = vmatpush3.msra.mxu1 %v100_v17  ;;  %1415 = vmatprep.subr.mxu0 %v112_v21  ;;  %v482_v49 = vld [vmem:[#allocation7 + $0xd8] sm:$0xff]  ;;  %v464_v51 = vld [vmem:[#allocation7 + $0x70] sm:$0xff]  ;;  %v463_v52 = vld [vmem:[#allocation7 + $0x68] sm:$0xff] }
  0x32   :  { %1437 = vmatprep.subr.mxu1 %v99_v22  ;;  %1416 = vmatpush3.msra.mxu0 %v112_v21  ;;  %v106_v25 = vld [vmem:[#allocation2 + $0x8] sm:$0xff]  ;;  %v481_v53 = vld [vmem:[#allocation7 + $0xd0] sm:$0xff]  ;;  %v480_v54 = vld [vmem:[#allocation7 + $0xc8] sm:$0xff] }
  0x33   :  { %1438 = vmatpush3.msra.mxu1 %v99_v22  ;;  %1417 = vmatprep.subr.mxu0 %v111_v23  ;;  %v94_v26 = vld [vmem:[#allocation2 + $0x7] sm:$0xff]  ;;  %v107_v27 = vld [vmem:[#allocation2 + $0x10] sm:$0xff]  ;;  %v459_v61 = vld [vmem:[#allocation7 + $0x48] sm:$0xff] }
  0x34   :  { %1439 = vmatprep.subr.mxu1 %v98_v24  ;;  %1418 = vmatpush3.msra.mxu0 %v111_v23  ;;  %v95_v28 = vld [vmem:[#allocation2 + $0xf] sm:$0xff]  ;;  %v96_v31 = vld [vmem:[#allocation2 + $0x27] sm:$0xff]  ;;  %v476_v62 = vld [vmem:[#allocation7 + $0xa8] sm:$0xff] }
  0x35   :  { %1419 = vmatprep.mubr.msk.f32.mxu0 %vm89_vm1, %v106_v25  ;;  %1440 = vmatpush3.msra.mxu1 %v98_v24  ;;  %v108_v30 = vld [vmem:[#allocation2 + $0x28] sm:$0xff]  ;;  %v109_v35 = vld [vmem:[#allocation2 + $0x30] sm:$0xff]  ;;  %v460_v59 = vld [vmem:[#allocation7 + $0x50] sm:$0xff] }
  0x36   :  { %1441 = vmatprep.mubr.msk.f32.mxu1 %vm89_vm1, %v94_v26  ;;  %1420 = vmatmul.mubr.msk.f32.vlgmr.msra.gmra.mxu0 %vm89_vm1, %v107_v27  ;;  %v97_v33 = vld [vmem:[#allocation2 + $0x2f] sm:$0xff]  ;;  %v477_v60 = vld [vmem:[#allocation7 + $0xb0] sm:$0xff]  ;;  %v472_v5 = vld [vmem:[#allocation7 + $0x88] sm:$0xff] }
  0x37   :  { %1442 = vmatmul.mubr.msk.f32.vlgmr.msra.gmra.mxu1 %vm89_vm1, %v95_v28  ;;  %1447 = vmatprep.subr.mxu0 %v325_v29  ;;  %v313_v36 = vld [vmem:[#allocation2 + $0x9] sm:$0xff]  ;;  %v314_v42 = vld [vmem:[#allocation2 + $0x11] sm:$0xff]  ;;  %v473_v3 = vld [vmem:[#allocation7 + $0x90] sm:$0xff] }
  0x38   :  { %1422 = vmatprep.mubr.msk.f32.mxu0 %vm89_vm1, %v108_v30  ;;  %1448 = vmatpush3.msra.mxu0 %v325_v29  ;;  %v315_v43 = vld [vmem:[#allocation2 + $0x29] sm:$0xff]  ;;  %v316_v44 = vld [vmem:[#allocation2 + $0x31] sm:$0xff]  ;;  %v456_v4 = vld [vmem:[#allocation7 + $0x30] sm:$0xff] }
  0x39   :  { %1444 = vmatprep.mubr.msk.f32.mxu1 %vm89_vm1, %v96_v31  ;;  %1449 = vmatprep.subr.mxu0 %v324_v32  ;;  %v465_v50 = vld [vmem:[#allocation7 + $0x78] sm:$0xff]  ;;  %v462_v55 = vld [vmem:[#allocation7 + $0x60] sm:$0xff]  ;;  %v455_v6 = vld [vmem:[#allocation7 + $0x28] sm:$0xff] }
  0x3a   :  { %1450 = vmatpush3.msra.mxu0 %v324_v32  ;;  %1469 = vmatprep.subr.mxu1 %v486_v45  ;;  %v479_v56 = vld [vmem:[#allocation7 + $0xc0] sm:$0xff]  ;;  %v461_v57 = vld [vmem:[#allocation7 + $0x58] sm:$0xff]  ;;  %v452_v11 = vld [vmem:[#allocation7 + $0x10] sm:$0xff] }
  0x3b   :  { %1445 = vmatmul.mubr.msk.f32.gmra.mxu1 %vm89_vm1, %v97_v33  ;;  %1451 = vmatprep.subr.mxu0 %v323_v34  ;;  %v478_v58 = vld [vmem:[#allocation7 + $0xb8] sm:$0xff]  ;;  %v475_v63 = vld [vmem:[#allocation7 + $0xa0] sm:$0xff]  ;;  %v451_v12 = vld [vmem:[#allocation7 + $0x8] sm:$0xff] }
  0x3c   :  { %1423 = vmatmul.mubr.msk.f32.gmra.mxu0 %vm89_vm1, %v109_v35  ;;  %1470 = vmatpush3.msra.mxu1 %v486_v45  ;;  %v458_v0 = vld [vmem:[#allocation7 + $0x40] sm:$0xff]  ;;  %v474_v1 = vld [vmem:[#allocation7 + $0x98] sm:$0xff]  ;;  %v1205_v23 = vld [vmem:[%s2043_s2] ss:$0 sm:$0xff] }
  0x3d   :  { %1452 = vmatpush3.msra.mxu0 %v323_v34  ;;  %1463 = vmatprep.mubr.msk.f32.mxu0 %vm89_vm1, %v313_v36  ;;  %v457_v2 = vld [vmem:[#allocation7 + $0x38] sm:$0xff]  ;;  %v471_v7 = vld [vmem:[#allocation7 + $0x80] sm:$0xff] }
  0x3e   :  { %1453 = vmatprep.subr.mxu0 %v322_v37  ;;  %1471 = vmatprep.subr.mxu1 %v485_v46  ;;  %v454_v8 = vld [vmem:[#allocation7 + $0x20] sm:$0xff]  ;;  %v677_v9 = vld [vmem:[#allocation7 + $0x178] sm:$0xff] }
  0x3f   :  { %1454 = vmatpush3.msra.mxu0 %v322_v37  ;;  %1472 = vmatpush3.msra.mxu1 %v485_v46  ;;  %v453_v10 = vld [vmem:[#allocation7 + $0x18] sm:$0xff]  ;;  %v450_v13 = vld [vmem:[#allocation7] sm:$0xff] }
  0x40   :  { %1455 = vmatprep.subr.mxu0 %v321_v38  ;;  %1473 = vmatprep.subr.mxu1 %v484_v47  ;;  %v674_v45 = vld [vmem:[#allocation7 + $0x160] sm:$0xff]  ;;  %v673_v46 = vld [vmem:[#allocation7 + $0x158] sm:$0xff] }
  0x41   :  { %1456 = vmatpush3.msra.mxu0 %v321_v38  ;;  %1474 = vmatpush3.msra.mxu1 %v484_v47 }
  0x42   :  { %1457 = vmatprep.subr.mxu0 %v320_v39  ;;  %1475 = vmatprep.subr.mxu1 %v483_v48 }
  0x43   :  { %1458 = vmatpush3.msra.mxu0 %v320_v39  ;;  %1476 = vmatpush3.msra.mxu1 %v483_v48 }
  0x44   :  { %1459 = vmatprep.subr.mxu0 %v319_v40  ;;  %1477 = vmatprep.subr.mxu1 %v482_v49 }
  0x45   :  { %1460 = vmatpush3.msra.mxu0 %v319_v40  ;;  %1478 = vmatpush3.msra.mxu1 %v482_v49 }
  0x46   :  { %1461 = vmatprep.subr.mxu0 %v318_v41  ;;  %1479 = vmatprep.subr.mxu1 %v481_v53 }
  0x47   :  { %1462 = vmatpush3.msra.mxu0 %v318_v41  ;;  %1480 = vmatpush3.msra.mxu1 %v481_v53  ;;  %v671_v53 = vld [vmem:[#allocation7 + $0x148] sm:$0xff] }
  0x48   :  { %1464 = vmatmul.mubr.msk.f32.vlgmr.msra.gmra.mxu0 %vm89_vm1, %v314_v42  ;;  %1507 = vmatprep.subr.mxu0 %v465_v50  ;;  %v676_v42 = vld [vmem:[#allocation7 + $0x170] sm:$0xff] }
  0x49   :  { %1466 = vmatprep.mubr.msk.f32.mxu0 %vm89_vm1, %v315_v43  ;;  %1508 = vmatpush3.msra.mxu0 %v465_v50  ;;  %v672_v50 = vld [vmem:[#allocation7 + $0x150] sm:$0xff] }
  0x4a   :  { %1509 = vmatprep.subr.mxu0 %v464_v51  ;;  %1481 = vmatprep.subr.mxu1 %v480_v54 }
  0x4b   :  { %1510 = vmatpush3.msra.mxu0 %v464_v51  ;;  %1482 = vmatpush3.msra.mxu1 %v480_v54  ;;  %v670_v54 = vld [vmem:[#allocation7 + $0x140] sm:$0xff] }
  0x4c   :  { %1467 = vmatmul.mubr.msk.f32.gmra.mxu0 %vm89_vm1, %v316_v44  ;;  %1511 = vmatprep.subr.mxu0 %v463_v52  ;;  %v675_v44 = vld [vmem:[#allocation7 + $0x168] sm:$0xff] }
  0x4d   :  { %1512 = vmatpush3.msra.mxu0 %v463_v52  ;;  %1483 = vmatprep.subr.mxu1 %v479_v56 }
  0x4e   :  { %1513 = vmatprep.subr.mxu0 %v462_v55  ;;  %1484 = vmatpush3.msra.mxu1 %v479_v56  ;;  %v668_v56 = vld [vmem:[#allocation7 + $0x130] sm:$0xff] }
  0x4f   :  { %1514 = vmatpush3.msra.mxu0 %v462_v55  ;;  %1485 = vmatprep.subr.mxu1 %v478_v58  ;;  %v669_v55 = vld [vmem:[#allocation7 + $0x138] sm:$0xff] }
  0x50   :  { %1515 = vmatprep.subr.mxu0 %v461_v57  ;;  %1486 = vmatpush3.msra.mxu1 %v478_v58  ;;  %v666_v58 = vld [vmem:[#allocation7 + $0x120] sm:$0xff] }
  0x51   :  { %1516 = vmatpush3.msra.mxu0 %v461_v57  ;;  %1487 = vmatprep.subr.mxu1 %v477_v60  ;;  %v667_v57 = vld [vmem:[#allocation7 + $0x128] sm:$0xff] }
  0x52   :  { %1517 = vmatprep.subr.mxu0 %v460_v59  ;;  %1488 = vmatpush3.msra.mxu1 %v477_v60  ;;  %v664_v60 = vld [vmem:[#allocation7 + $0x110] sm:$0xff] }
  0x53   :  { %1518 = vmatpush3.msra.mxu0 %v460_v59  ;;  %1489 = vmatprep.subr.mxu1 %v476_v62  ;;  %v665_v59 = vld [vmem:[#allocation7 + $0x118] sm:$0xff] }
  0x54   :  { %1519 = vmatprep.subr.mxu0 %v459_v61  ;;  %1490 = vmatpush3.msra.mxu1 %v476_v62  ;;  %v662_v62 = vld [vmem:[#allocation7 + $0x100] sm:$0xff] }
  0x55   :  { %1520 = vmatpush3.msra.mxu0 %v459_v61  ;;  %1491 = vmatprep.subr.mxu1 %v475_v63  ;;  %v663_v61 = vld [vmem:[#allocation7 + $0x108] sm:$0xff] }
  0x56   :  { %1521 = vmatprep.subr.mxu0 %v458_v0  ;;  %1492 = vmatpush3.msra.mxu1 %v475_v63 }
  0x57   :  { %1522 = vmatpush3.msra.mxu0 %v458_v0  ;;  %1493 = vmatprep.subr.mxu1 %v474_v1 }
  0x58   :  { %1523 = vmatprep.subr.mxu0 %v457_v2  ;;  %1494 = vmatpush3.msra.mxu1 %v474_v1 }
  0x59   :  { %1524 = vmatpush3.msra.mxu0 %v457_v2  ;;  %1495 = vmatprep.subr.mxu1 %v473_v3  ;;  %v813_v2 = vld [vmem:[%s2048_s7 + $0x78] sm:$0xff] }
  0x5a   :  { %1525 = vmatprep.subr.mxu0 %v456_v4  ;;  %1496 = vmatpush3.msra.mxu1 %v473_v3  ;;  %v1222_v3 = vld [vmem:[%s2048_s7 + $0xf8] sm:$0xff] }
  0x5b   :  { %1526 = vmatpush3.msra.mxu0 %v456_v4  ;;  %1497 = vmatprep.subr.mxu1 %v472_v5  ;;  %v812_v4 = vld [vmem:[%s2048_s7 + $0x70] sm:$0xff] }
  0x5c   :  { %1527 = vmatprep.subr.mxu0 %v455_v6  ;;  %1498 = vmatpush3.msra.mxu1 %v472_v5  ;;  %v1221_v5 = vld [vmem:[%s2048_s7 + $0xf0] sm:$0xff] }
  0x5d   :  { %1528 = vmatpush3.msra.mxu0 %v455_v6  ;;  %1499 = vmatprep.subr.mxu1 %v471_v7  ;;  %v811_v6 = vld [vmem:[%s2048_s7 + $0x68] sm:$0xff] }
  0x5e   :  { %1529 = vmatprep.subr.mxu0 %v454_v8  ;;  %1500 = vmatpush3.msra.mxu1 %v471_v7  ;;  %v1220_v7 = vld [vmem:[%s2048_s7 + $0xe8] sm:$0xff] }
  0x5f   :  { %1530 = vmatpush3.msra.mxu0 %v454_v8  ;;  %1545 = vmatprep.subr.mxu1 %v677_v9  ;;  %v810_v8 = vld [vmem:[%s2048_s7 + $0x60] sm:$0xff] }
  0x60   :  { %1531 = vmatprep.subr.mxu0 %v453_v10 }
  0x61   :  { %1532 = vmatpush3.msra.mxu0 %v453_v10  ;;  %v809_v10 = vld [vmem:[%s2048_s7 + $0x58] sm:$0xff] }
  0x62   :  { %1533 = vmatprep.subr.mxu0 %v452_v11 }
  0x63   :  { %1534 = vmatpush3.msra.mxu0 %v452_v11  ;;  %v1218_v11 = vld [vmem:[%s2048_s7 + $0xd8] sm:$0xff] }
  0x64   :  { %1535 = vmatprep.subr.mxu0 %v451_v12 }
  0x65   :  { %1536 = vmatpush3.msra.mxu0 %v451_v12  ;;  %v808_v12 = vld [vmem:[%s2048_s7 + $0x50] sm:$0xff] }
  0x66   :  { %1537 = vmatprep.subr.mxu0 %v450_v13 }
  0x67   :  { %1538 = vmatpush3.msra.mxu0 %v450_v13  ;;  %v1217_v13 = vld [vmem:[%s2048_s7 + $0xd0] sm:$0xff] }
  0x68   :  { %1583 = vmatprep.subr.mxu0 %v813_v2 }
  0xf6   :  { %v1421_v14 = vpop.f32.mrf.mxu0 }
  0xf7   :  { %v1443_v15 = vpop.f32.mrf.mxu1 }
  0xf8   :  { %v197_v16 = vpop.f32.mrf.mxu0  ;;  %v300_v21 = vadd.f32 %v1443_v15, %v1421_v14  ;;  %v807_v14 = vld [vmem:[%s2048_s7 + $0x48] sm:$0xff] }
  0xf9   :  { %v294_v18 = vpop.f32.mrf.mxu1  ;;  %v1216_v15 = vld [vmem:[%s2048_s7 + $0xc8] sm:$0xff] }
  0xfa   :  { %v295_v24 = vadd.f32 %v294_v18, %v197_v16  ;;  %v806_v16 = vld [vmem:[%s2048_s7 + $0x40] sm:$0xff]  ;;  %v805_v18 = vld [vmem:[%s2048_s7 + $0x38] sm:$0xff] }
  0xfb   :  { %v1446_v19 = vpop.f32.mrf.mxu1 }
  0xfc   :  { %v1424_v17 = vpop.f32.mrf.mxu0 }
  0xfd   :  { %v304_v26 = vpop.f32.mrf.mxu1  ;;  %v310_v28 = vadd.f32 %v1446_v19, %v1424_v17  ;;  %v1215_v17 = vld [vmem:[%s2048_s7 + $0xc0] sm:$0xff]  ;;  %v1214_v19 = vld [vmem:[%s2048_s7 + $0xb8] sm:$0xff] }
  0xfe   :  { %v207_v20 = vpop.f32.mrf.mxu0 }
  0xff   :  { %v305_v32 = vadd.f32 %v304_v26, %v207_v20  ;;  %v804_v20 = vld [vmem:[%s2048_s7 + $0x30] sm:$0xff]  ;;  %v1211_v26 = vld [vmem:[%s2048_s7 + $0xa0] sm:$0xff] }
 0x108   :  { %v1465_v22 = vpop.f32.mrf.mxu0 }
 0x109   :  { %v424_v25 = vadd.f32 %v1465_v22, %v300_v21  ;;  %v1784_v21 = vmov -inf   ;;  %v1213_v22 = vld [vmem:[%s2048_s7 + $0xb0] sm:$0xff] }
 0x10a   :  { %v404_v27 = vpop.f32.mrf.mxu0  ;;  %79 = vst [vmem:[#allocation4 + $0x7] sm:$0x1] %v1784_v21  ;;  %80 = vst [vmem:[#allocation4 + $0x1f] sm:$0x1] %v1784_v21  ;;  %v1087_v21 = vld [vmem:[#allocation9] sm:$0xff] }
 0x10b   :  { %v435_v29 = vadd.f32 %v1205_v23, %v424_v25  ;;  %v423_v30 = vadd.f32 %v404_v27, %v295_v24  ;;  %v1212_v24 = vld [vmem:[%s2048_s7 + $0xa8] sm:$0xff]  ;;  %v802_v25 = vld [vmem:[%s2048_s7 + $0x20] sm:$0xff]  ;;  %v801_v27 = vld [vmem:[%s2048_s7 + $0x18] sm:$0xff] }
 0x10c   :  { %v1468_v31 = vpop.f32.mrf.mxu0 }
 0x10d   :  { %v439_v33 = vmax.f32 %v435_v29, 0.0  ;;  %v434_v34 = vadd.f32 %v1205_v23, %v423_v30  ;;  %v426_v35 = vadd.f32 %v1468_v31, %v310_v28  ;;  %v1210_v28 = vld [vmem:[%s2048_s7 + $0x98] sm:$0xff]  ;;  %v800_v29 = vld [vmem:[%s2048_s7 + $0x10] sm:$0xff]  ;;  %v799_v31 = vld [vmem:[%s2048_s7 + $0x8] sm:$0xff] }
 0x10e   :  { %v414_v36 = vpop.f32.mrf.mxu0  ;;  %v1209_v30 = vld [vmem:[%s2048_s7 + $0x90] sm:$0xff] }
 0x10f   :  { %443 = vst [vmem:[#allocation3 + $0x10] sm:$0xff] %v439_v33  ;;  %v438_v37 = vmax.f32 %v434_v34, 0.0  ;;  %v437_v38 = vadd.f32 %v1205_v23, %v426_v35  ;;  %v425_v39 = vadd.f32 %v414_v36, %v305_v32  ;;  %v1208_v32 = vld [vmem:[%s2048_s7 + $0x88] sm:$0xff]  ;;  %v1207_v34 = vld [vmem:[%s2048_s7 + $0x80] sm:$0xff]  ;;  %v1238_v35 = vld [vmem:[%s2048_s7 + $0x178] sm:$0xff] }
 0x110   :  { %v1094_v36 = vld [vmem:[#allocation9 + $0x38] sm:$0xff] }
 0x111   :  { %442 = vst [vmem:[#allocation3 + $0x8] sm:$0xff] %v438_v37  ;;  %v441_v40 = vmax.f32 %v437_v38, 0.0  ;;  %v436_v41 = vadd.f32 %v1205_v23, %v425_v39  ;;  %1501 = vmatprep.mubr.f32.mxu1 %v438_v37  ;;  %v803_v23 = vld [vmem:[%s2048_s7 + $0x28] sm:$0xff] }
 0x112   :  { %1502 = vmatmul.mubr.f32.vlgmr.msra.gmra.mxu1 %v439_v33  ;;  %v798_v33 = vld [vmem:[%s2048_s7] sm:$0xff] }
 0x113   :  { %445 = vst [vmem:[#allocation3 + $0x30] sm:$0xff] %v441_v40  ;;  %v440_v43 = vmax.f32 %v436_v41, 0.0  ;;  %1546 = vmatpush3.msra.mxu1 %v677_v9  ;;  %v1219_v9 = vld [vmem:[%s2048_s7 + $0xe0] sm:$0xff] }
 0x114   :  { %1547 = vmatprep.subr.mxu1 %v676_v42 }
 0x115   :  { %444 = vst [vmem:[#allocation3 + $0x28] sm:$0xff] %v440_v43  ;;  %1548 = vmatpush3.msra.mxu1 %v676_v42  ;;  %1504 = vmatprep.mubr.f32.mxu1 %v440_v43 }
 0x116   :  { %1549 = vmatprep.subr.mxu1 %v675_v44  ;;  %1505 = vmatmul.mubr.f32.gmra.mxu1 %v441_v40  ;;  %v658_v63 = vld [vmem:[#allocation3 + $0x11] sm:$0xff] }
 0x117   :  { %1550 = vmatpush3.msra.mxu1 %v675_v44 }
 0x118   :  { %v446_v47 = vld [vmem:[#allocation3 + $0x7] sm:$0xff]  ;;  %v447_v48 = vld [vmem:[#allocation3 + $0xf] sm:$0xff]  ;;  %1551 = vmatprep.subr.mxu1 %v674_v45 }
 0x119   :  { %v657_v49 = vld [vmem:[#allocation3 + $0x9] sm:$0xff]  ;;  %1539 = vmatprep.mubr.f32.mxu0 %v446_v47  ;;  %1552 = vmatpush3.msra.mxu1 %v674_v45 }
 0x11a   :  { %1577 = vmatprep.mubr.f32.mxu1 %v657_v49  ;;  %1540 = vmatmul.mubr.f32.vlgmr.msra.gmra.mxu0 %v447_v48  ;;  %v660_v1 = vld [vmem:[#allocation3 + $0x31] sm:$0xff] }
 0x11b   :  { %1553 = vmatprep.subr.mxu1 %v673_v46  ;;  %1584 = vmatpush3.msra.mxu0 %v813_v2 }
 0x11c   :  { %v448_v51 = vld [vmem:[#allocation3 + $0x27] sm:$0xff]  ;;  %v449_v52 = vld [vmem:[#allocation3 + $0x2f] sm:$0xff]  ;;  %1554 = vmatpush3.msra.mxu1 %v673_v46  ;;  %1585 = vmatprep.subr.mxu0 %v812_v4  ;;  %v1206_v46 = vld [vmem:[%s2045_s4] ss:$0 sm:$0xff] }
 0x11d   :  { %1542 = vmatprep.mubr.f32.mxu0 %v448_v51  ;;  %1555 = vmatprep.subr.mxu1 %v672_v50  ;;  %v659_v0 = vld [vmem:[#allocation3 + $0x29] sm:$0xff] }
 0x11e   :  { %1543 = vmatmul.mubr.f32.gmra.mxu0 %v449_v52  ;;  %1556 = vmatpush3.msra.mxu1 %v672_v50 }
 0x11f   :  { %1557 = vmatprep.subr.mxu1 %v671_v53  ;;  %1586 = vmatpush3.msra.mxu0 %v812_v4 }
 0x120   :  { %1558 = vmatpush3.msra.mxu1 %v671_v53  ;;  %1587 = vmatprep.subr.mxu0 %v811_v6 }
 0x121   :  { %1559 = vmatprep.subr.mxu1 %v670_v54  ;;  %1588 = vmatpush3.msra.mxu0 %v811_v6 }
 0x122   :  { %1560 = vmatpush3.msra.mxu1 %v670_v54  ;;  %1589 = vmatprep.subr.mxu0 %v810_v8 }
 0x123   :  { %1561 = vmatprep.subr.mxu1 %v669_v55  ;;  %1590 = vmatpush3.msra.mxu0 %v810_v8  ;;  %v1237_v8 = vld [vmem:[%s2048_s7 + $0x170] sm:$0xff] }
 0x124   :  { %1562 = vmatpush3.msra.mxu1 %v669_v55  ;;  %1591 = vmatprep.subr.mxu0 %v809_v10 }
 0x125   :  { %1563 = vmatprep.subr.mxu1 %v668_v56  ;;  %1592 = vmatpush3.msra.mxu0 %v809_v10  ;;  %v1236_v10 = vld [vmem:[%s2048_s7 + $0x168] sm:$0xff] }
 0x126   :  { %1564 = vmatpush3.msra.mxu1 %v668_v56  ;;  %1593 = vmatprep.subr.mxu0 %v808_v12 }
 0x127   :  { %1565 = vmatprep.subr.mxu1 %v667_v57  ;;  %1594 = vmatpush3.msra.mxu0 %v808_v12  ;;  %v1235_v12 = vld [vmem:[%s2048_s7 + $0x160] sm:$0xff] }
 0x128   :  { %1566 = vmatpush3.msra.mxu1 %v667_v57  ;;  %1595 = vmatprep.subr.mxu0 %v807_v14 }
 0x129   :  { %1567 = vmatprep.subr.mxu1 %v666_v58  ;;  %1596 = vmatpush3.msra.mxu0 %v807_v14  ;;  %v1234_v14 = vld [vmem:[%s2048_s7 + $0x158] sm:$0xff] }
 0x12a   :  { %1568 = vmatpush3.msra.mxu1 %v666_v58  ;;  %1597 = vmatprep.subr.mxu0 %v806_v16 }
 0x12b   :  { %1569 = vmatprep.subr.mxu1 %v665_v59  ;;  %1598 = vmatpush3.msra.mxu0 %v806_v16  ;;  %v1233_v16 = vld [vmem:[%s2048_s7 + $0x150] sm:$0xff] }
 0x12c   :  { %1570 = vmatpush3.msra.mxu1 %v665_v59  ;;  %1599 = vmatprep.subr.mxu0 %v805_v18 }
 0x12d   :  { %1571 = vmatprep.subr.mxu1 %v664_v60  ;;  %1600 = vmatpush3.msra.mxu0 %v805_v18  ;;  %v1232_v18 = vld [vmem:[%s2048_s7 + $0x148] sm:$0xff] }
 0x12e   :  { %1572 = vmatpush3.msra.mxu1 %v664_v60  ;;  %1601 = vmatprep.subr.mxu0 %v804_v20 }
 0x12f   :  { %1573 = vmatprep.subr.mxu1 %v663_v61  ;;  %1602 = vmatpush3.msra.mxu0 %v804_v20  ;;  %v1231_v20 = vld [vmem:[%s2048_s7 + $0x140] sm:$0xff] }
 0x130   :  { %1574 = vmatpush3.msra.mxu1 %v663_v61  ;;  %1603 = vmatprep.subr.mxu0 %v803_v23 }
 0x131   :  { %1575 = vmatprep.subr.mxu1 %v662_v62  ;;  %1604 = vmatpush3.msra.mxu0 %v803_v23  ;;  %v1084_v23 = vld [vmem:[%s2041_s0] ss:$2 sm:$0xff] }
 0x132   :  { %1576 = vmatpush3.msra.mxu1 %v662_v62  ;;  %1605 = vmatprep.subr.mxu0 %v802_v25 }
 0x133   :  { %1578 = vmatmul.mubr.f32.vlgmr.msra.gmra.mxu1 %v658_v63  ;;  %1618 = vmatprep.subr.mxu1 %v1222_v3 }
 0x134   :  { %1580 = vmatprep.mubr.f32.mxu1 %v659_v0  ;;  %1619 = vmatpush3.msra.mxu1 %v1222_v3 }
 0x135   :  { %1620 = vmatprep.subr.mxu1 %v1221_v5  ;;  %1606 = vmatpush3.msra.mxu0 %v802_v25  ;;  %v1239_v25 = vld [vmem:[%s2041_s0 + $0x10] ss:$2 sm:$0xff] }
 0x136   :  { %1621 = vmatpush3.msra.mxu1 %v1221_v5  ;;  %1607 = vmatprep.subr.mxu0 %v801_v27 }
 0x137   :  { %1581 = vmatmul.mubr.f32.gmra.mxu1 %v660_v1  ;;  %1622 = vmatprep.subr.mxu1 %v1220_v7 }
 0x138   :  { %1623 = vmatpush3.msra.mxu1 %v1220_v7  ;;  %1608 = vmatpush3.msra.mxu0 %v801_v27  ;;  %v1227_v27 = vld [vmem:[%s2048_s7 + $0x120] sm:$0xff] }
 0x139   :  { %1624 = vmatprep.subr.mxu1 %v1219_v9  ;;  %1609 = vmatprep.subr.mxu0 %v800_v29 }
 0x13a   :  { %1625 = vmatpush3.msra.mxu1 %v1219_v9  ;;  %1610 = vmatpush3.msra.mxu0 %v800_v29  ;;  %v1093_v9 = vld [vmem:[#allocation9 + $0x30] sm:$0xff]  ;;  %v1225_v29 = vld [vmem:[%s2048_s7 + $0x110] sm:$0xff] }
 0x13b   :  { %1626 = vmatprep.subr.mxu1 %v1218_v11  ;;  %1611 = vmatprep.subr.mxu0 %v799_v31 }
 0x13c   :  { %1627 = vmatpush3.msra.mxu1 %v1218_v11  ;;  %1612 = vmatpush3.msra.mxu0 %v799_v31  ;;  %v1092_v11 = vld [vmem:[#allocation9 + $0x28] sm:$0xff]  ;;  %v1223_v31 = vld [vmem:[%s2048_s7 + $0x100] sm:$0xff] }
 0x13d   :  { %1628 = vmatprep.subr.mxu1 %v1217_v13  ;;  %1613 = vmatprep.subr.mxu0 %v798_v33 }
 0x13e   :  { %1629 = vmatpush3.msra.mxu1 %v1217_v13  ;;  %1614 = vmatpush3.msra.mxu0 %v798_v33  ;;  %v1091_v13 = vld [vmem:[#allocation9 + $0x20] sm:$0xff] }
 0x13f   :  { %1630 = vmatprep.subr.mxu1 %v1216_v15  ;;  %1653 = vmatprep.subr.mxu0 %v1238_v35 }
 0x140   :  { %1631 = vmatpush3.msra.mxu1 %v1216_v15  ;;  %v1090_v15 = vld [vmem:[#allocation9 + $0x18] sm:$0xff] }
 0x141   :  { %1632 = vmatprep.subr.mxu1 %v1215_v17 }
 0x142   :  { %1633 = vmatpush3.msra.mxu1 %v1215_v17  ;;  %v1089_v17 = vld [vmem:[#allocation9 + $0x10] sm:$0xff] }
 0x143   :  { %1634 = vmatprep.subr.mxu1 %v1214_v19 }
 0x144   :  { %1635 = vmatpush3.msra.mxu1 %v1214_v19  ;;  %v1088_v19 = vld [vmem:[#allocation9 + $0x8] sm:$0xff] }
 0x145   :  { %1636 = vmatprep.subr.mxu1 %v1213_v22 }
 0x146   :  { %1637 = vmatpush3.msra.mxu1 %v1213_v22  ;;  %v1230_v22 = vld [vmem:[%s2048_s7 + $0x138] sm:$0xff] }
 0x147   :  { %1638 = vmatprep.subr.mxu1 %v1212_v24 }
 0x148   :  { %1639 = vmatpush3.msra.mxu1 %v1212_v24  ;;  %v1229_v24 = vld [vmem:[%s2048_s7 + $0x130] sm:$0xff] }
 0x149   :  { %1640 = vmatprep.subr.mxu1 %v1211_v26 }
 0x14a   :  { %1641 = vmatpush3.msra.mxu1 %v1211_v26  ;;  %v1228_v26 = vld [vmem:[%s2048_s7 + $0x128] sm:$0xff] }
 0x14b   :  { %1642 = vmatprep.subr.mxu1 %v1210_v28 }
 0x14c   :  { %1643 = vmatpush3.msra.mxu1 %v1210_v28  ;;  %v1226_v28 = vld [vmem:[%s2048_s7 + $0x118] sm:$0xff] }
 0x14d   :  { %1644 = vmatprep.subr.mxu1 %v1209_v30 }
 0x14e   :  { %1645 = vmatpush3.msra.mxu1 %v1209_v30  ;;  %v1224_v30 = vld [vmem:[%s2048_s7 + $0x108] sm:$0xff] }
 0x14f   :  { %1646 = vmatprep.subr.mxu1 %v1208_v32 }
 0x150   :  { %1647 = vmatpush3.msra.mxu1 %v1208_v32  ;;  %v1073_v32 = vlaneseq }
 0x151   :  { %1648 = vmatprep.subr.mxu1 %v1207_v34 }
 0x152   :  { %1649 = vmatpush3.msra.mxu1 %v1207_v34 }
 0x153   :  { %1688 = vmatprep.subr.mxu1 %v1094_v36 }
 0x1d2   :  { %v1503_v37 = vpop.f32.mrf.mxu1 }
 0x1d4   :  { %v553_v39 = vpop.f32.mrf.mxu1 }
 0x1d6   :  { %v1506_v41 = vpop.f32.mrf.mxu1 }
 0x1d8   :  { %v563_v43 = vpop.f32.mrf.mxu1 }
 0x1da   :  { %v1541_v38 = vpop.f32.mrf.mxu0 }
 0x1db   :  { %v644_v44 = vadd.f32 %v1541_v38, %v1503_v37  ;;  %v1240_v38 = vld [vmem:[%s2047_s6] ss:$0 sm:$0xff] }
 0x1dc   :  { %v638_v40 = vpop.f32.mrf.mxu0 }
 0x1dd   :  { %v639_v47 = vadd.f32 %v638_v40, %v553_v39 }
 0x1de   :  { %v1544_v42 = vpop.f32.mrf.mxu0 }
 0x1df   :  { %v654_v51 = vadd.f32 %v1544_v42, %v1506_v41 }
 0x1e0   :  { %v648_v49 = vpop.f32.mrf.mxu0 }
 0x1e1   :  { %v649_v55 = vadd.f32 %v648_v49, %v563_v43 }
 0x1f3   :  { %v1579_v45 = vpop.f32.mrf.mxu1 }
 0x1f4   :  { %v764_v48 = vadd.f32 %v1579_v45, %v644_v44 }
 0x1f5   :  { %v744_v50 = vpop.f32.mrf.mxu1 }
 0x1f6   :  { %v775_v52 = vadd.f32 %v1206_v46, %v764_v48  ;;  %v763_v53 = vadd.f32 %v744_v50, %v639_v47 }
 0x1f7   :  { %v1582_v54 = vpop.f32.mrf.mxu1 }
 0x1f8   :  { %779 = vst [vmem:[#allocation4 + $0x10] sm:$0xff] %v775_v52  ;;  %v774_v56 = vadd.f32 %v1206_v46, %v763_v53  ;;  %v766_v57 = vadd.f32 %v1582_v54, %v654_v51 }
 0x1f9   :  { %v754_v58 = vpop.f32.mrf.mxu1 }
 0x1fa   :  { %778 = vst [vmem:[#allocation4 + $0x8] sm:$0xff] %v774_v56  ;;  %v777_v59 = vadd.f32 %v1206_v46, %v766_v57  ;;  %v765_v60 = vadd.f32 %v754_v58, %v649_v55 }
 0x1fc   :  { %781 = vst [vmem:[#allocation4 + $0x28] sm:$0xff] %v777_v59  ;;  %v776_v61 = vadd.f32 %v1206_v46, %v765_v60 }
 0x1fe   :  { %780 = vst [vmem:[#allocation4 + $0x20] sm:$0xff] %v776_v61 }
 0x201   :  { %v783_v62 = vld [vmem:[#allocation4 + $0x7] ss:$2 sm:$0xff]  ;;  %v787_v63 = vld [vmem:[#allocation4 + $0x8] ss:$2 sm:$0xff] }
 0x202   :  { %v794_v0 = vmax.f32 %v783_v62, %v787_v63  ;;  %v791_v1 = vld [vmem:[#allocation4 + $0x9] ss:$2 sm:$0xff] }
 0x204   :  { %v796_v2 = vmax.f32 %v794_v0, %v791_v1 }
 0x205   :  { %v785_v3 = vld [vmem:[#allocation4 + $0x1f] ss:$2 sm:$0xff]  ;;  %v789_v4 = vld [vmem:[#allocation4 + $0x20] ss:$2 sm:$0xff] }
 0x206   :  { %1615 = vmatprep.mubr.f32.mxu0 %v796_v2  ;;  %1650 = vmatprep.mubr.f32.mxu1 %v796_v2  ;;  %v795_v5 = vmax.f32 %v785_v3, %v789_v4  ;;  %v793_v6 = vld [vmem:[#allocation4 + $0x21] ss:$2 sm:$0xff] }
 0x208   :  { %v1972_v7 = vmax.f32 %v795_v5, %v793_v6 }
 0x20a   :  { %1616 = vmatmul.mubr.f32.vlgmr.msra.gmra.mxu0 %v1972_v7  ;;  %1651 = vmatmul.mubr.f32.vlgmr.msra.gmra.mxu1 %v1972_v7 }
 0x20b   :  { %1654 = vmatpush3.msra.mxu0 %v1238_v35  ;;  %1685 = vmatprep.mubr.f32.mxu0 %v796_v2  ;;  %v1074_v35 = vand.u32 127, %v1073_v32 }
 0x20c   :  { %1655 = vmatprep.subr.mxu0 %v1237_v8  ;;  %1689 = vmatpush3.msra.mxu1 %v1094_v36 }
 0x20d   :  { %1656 = vmatpush3.msra.mxu0 %v1237_v8  ;;  %1690 = vmatprep.subr.mxu1 %v1093_v9  ;;  %vm1075_vm2 = vcmp.lt.s32.totalorder %v1074_v35, 8 }
 0x20e   :  { %1657 = vmatprep.subr.mxu0 %v1236_v10  ;;  %1691 = vmatpush3.msra.mxu1 %v1093_v9 }
 0x20f   :  { %1658 = vmatpush3.msra.mxu0 %v1236_v10  ;;  %1692 = vmatprep.subr.mxu1 %v1092_v11 }
 0x210   :  { %1659 = vmatprep.subr.mxu0 %v1235_v12  ;;  %1693 = vmatpush3.msra.mxu1 %v1092_v11 }
 0x211   :  { %1660 = vmatpush3.msra.mxu0 %v1235_v12  ;;  %1694 = vmatprep.subr.mxu1 %v1091_v13 }
 0x212   :  { %1661 = vmatprep.subr.mxu0 %v1234_v14  ;;  %1695 = vmatpush3.msra.mxu1 %v1091_v13 }
 0x213   :  { %1662 = vmatpush3.msra.mxu0 %v1234_v14  ;;  %1696 = vmatprep.subr.mxu1 %v1090_v15 }
 0x214   :  { %1663 = vmatprep.subr.mxu0 %v1233_v16  ;;  %1697 = vmatpush3.msra.mxu1 %v1090_v15 }
 0x215   :  { %1664 = vmatpush3.msra.mxu0 %v1233_v16  ;;  %1698 = vmatprep.subr.mxu1 %v1089_v17 }
 0x216   :  { %1665 = vmatprep.subr.mxu0 %v1232_v18  ;;  %1699 = vmatpush3.msra.mxu1 %v1089_v17 }
 0x217   :  { %1666 = vmatpush3.msra.mxu0 %v1232_v18  ;;  %1700 = vmatprep.subr.mxu1 %v1088_v19 }
 0x218   :  { %1667 = vmatprep.subr.mxu0 %v1231_v20  ;;  %1701 = vmatpush3.msra.mxu1 %v1088_v19 }
 0x219   :  { %1668 = vmatpush3.msra.mxu0 %v1231_v20  ;;  %1702 = vmatprep.subr.mxu1 %v1087_v21 }
 0x21a   :  { %1669 = vmatprep.subr.mxu0 %v1230_v22  ;;  %1703 = vmatpush3.msra.mxu1 %v1087_v21 }
 0x21b   :  { %1670 = vmatpush3.msra.mxu0 %v1230_v22  ;;  %1704 = vmatprep.mubr.msk.f32.mxu1 %vm89_vm1, %v1084_v23 }
 0x21c   :  { %1671 = vmatprep.subr.mxu0 %v1229_v24  ;;  %1705 = vmatmul.mubr.msk.f32.vlgmr.msra.gmra.mxu1 %vm89_vm1, %v1239_v25 }
 0x21d   :  { %1672 = vmatpush3.msra.mxu0 %v1229_v24 }
 0x21e   :  { %1673 = vmatprep.subr.mxu0 %v1228_v26 }
 0x21f   :  { %1674 = vmatpush3.msra.mxu0 %v1228_v26 }
 0x220   :  { %1675 = vmatprep.subr.mxu0 %v1227_v27 }
 0x221   :  { %1676 = vmatpush3.msra.mxu0 %v1227_v27 }
 0x222   :  { %1677 = vmatprep.subr.mxu0 %v1226_v28 }
 0x223   :  { %1678 = vmatpush3.msra.mxu0 %v1226_v28 }
 0x224   :  { %1679 = vmatprep.subr.mxu0 %v1225_v29 }
 0x225   :  { %1680 = vmatpush3.msra.mxu0 %v1225_v29 }
 0x226   :  { %1681 = vmatprep.subr.mxu0 %v1224_v30 }
 0x227   :  { %1682 = vmatpush3.msra.mxu0 %v1224_v30 }
 0x228   :  { %1683 = vmatprep.subr.mxu0 %v1223_v31 }
 0x229   :  { %1684 = vmatpush3.msra.mxu0 %v1223_v31 }
 0x22a   :  { %1686 = vmatmul.mubr.f32.vlgmr.msra.gmra.mxu0 %v1972_v7 }
 0x2ca   :  { %v1652_v33 = vpop.f32.mrf.mxu1  ;;  %v1617_v34 = vpop.f32.mrf.mxu0 }
 0x2cb   :  { %v1081_v40 = vmax.f32 %v1617_v34, %v1652_v33 }
 0x2cc   :  { %v972_v36 = vpop.f32.mrf.mxu1  ;;  %v880_v39 = vpop.f32.mrf.mxu0 }
 0x2cd   :  { %v1080_v45 = vmax.f32 %v880_v39, %v972_v36 }
 0x2dc   :  { %v1706_v37 = vpop.f32.mrf.mxu1 }
 0x2dd   :  { %v1180_v41 = vadd.f32 %v1706_v37, %v1240_v38 }
 0x2de   :  { %v1174_v44 = vpop.f32.mrf.mxu1 }
 0x2df   :  { %v1175_v50 = vadd.f32 %v1240_v38, %v1174_v44 }
 0x2ea   :  { %v1687_v42 = vpop.f32.mrf.mxu0 }
 0x2eb   :  { %v1079_v43 = vsel %vm1075_vm2, -inf, %v1687_v42 }
 0x2ec   :  { %v1083_v46 = vmax.f32 %v1081_v40, %v1079_v43  ;;  %v1064_v47 = vpop.f32.mrf.mxu0 }
 0x2ed   :  { %v1078_v48 = vsel %vm1075_vm2, -inf, %v1064_v47 }
 0x2ee   :  { %v1184_v49 = vadd.f32 %v1180_v41, %v1083_v46  ;;  %v1082_v51 = vmax.f32 %v1080_v45, %v1078_v48 }
 0x2f0   :  { %1186 = vst.msk [vmem:[%s2049_s8 + $0x8] sm:$0xff] %vm89_vm1, %v1184_v49  ;;  %v1183_v52 = vadd.f32 %v1175_v50, %v1082_v51 }
 0x2f2   :  { %1185 = vst.msk [vmem:[%s2049_s8] sm:$0xff] %vm89_vm1, %v1183_v52 }
 0x2f3   :  { %1191 = vsyncpa [#allocation6], 1 }
 0x2f4   :  { %1192 = vsyncpa [#allocation8], 1 }

</bundles_post_ra>
